<compile_context>
chip_gen: v7x
topology: tpu7x:2x2x1
jax: 0.10.0
libtpu: 0.0.40
codegen_flags: <defaults>
</compile_context>

<pallas_src>
import functools

import jax
import jax.numpy as jnp
from jax.experimental import pallas as pl
from jax.experimental.pallas import tpu as pltpu

LANE = 128      # lane width: output-channel padding target (unmasked vst)
SUBLANE = 8     # f32 sublane packing: node-count padding target

# Per-step VMEM budget (bytes) for one graph's adjacency block in the fused
# (whole-graph) kernel; above this we switch to the row-tiled path.
_FUSED_ADJ_BUDGET = 8 * 1024 * 1024
_ROW_TILE = 256


def _round_up(x, m):
    return ((x + m - 1) // m) * m


def _vmem_limit_bytes():
    """Generation-aware scoped-VMEM limit: half of physical capacity
    (64 MiB on v5e/v6e's 128 MiB, 32 MiB on v7x's 64 MiB)."""
    cap = 128 * 1024 * 1024
    try:
        cap = int(getattr(pltpu.get_tpu_info(), "vmem_capacity_bytes", cap))
    except Exception:
        pass
    return min(cap // 2, 64 * 1024 * 1024)


# ---------------------------------------------------------------------------
# Kernels
# ---------------------------------------------------------------------------

def _gcn_fused_kernel(adj_ref, x_ref, d_ref, w_ref, b_ref, out_ref):
    """Whole-graph GCN step for a block of Bb graphs.

    Blocks: adj (Bb,N,N) cdt | x (Bb,N,Cin) f32 | d (Bb,N,1) f32
            w (Cin,Cp) cdt  | b (1,Cp) f32     | out (Bb,N,Cp) f32
    out = d * (A @ (d * (X @ W))) + b   (Laplacian never materialized).
    """
    Bb, N, C_in = x_ref.shape
    Cp = w_ref.shape[1]
    cdt = w_ref.dtype

    # Feature projection as one flattened matmul -> taller M for the MXU.
    x_flat = x_ref[...].reshape(Bb * N, C_in).astype(cdt)
    xw = jnp.dot(x_flat, w_ref[...],
                 preferred_element_type=jnp.float32).reshape(Bb, N, Cp)

    # Fold the column-side D^{-1/2}, then propagate (batched matmul on MXU).
    z = (d_ref[...] * xw).astype(cdt)
    h = jnp.einsum("bij,bjc->bic", adj_ref[...], z,
                   preferred_element_type=jnp.float32)

    out_ref[...] = d_ref[...] * h + b_ref[...]


def _gcn_project_kernel(x_ref, d_ref, w_ref, z_ref):
    """Row-tiled path, pass 1:  z = d * (X @ W)  per graph.
    Blocks: x (1,N,Cin) f32 | d (1,N,1) f32 | w (Cin,Cp) cdt | z (1,N,Cp) cdt."""
    Bb, N, C_in = x_ref.shape
    cdt = w_ref.dtype
    x_flat = x_ref[...].reshape(Bb * N, C_in).astype(cdt)
    xw = jnp.dot(x_flat, w_ref[...],
                 preferred_element_type=jnp.float32).reshape(Bb, N, -1)
    z_ref[...] = (d_ref[...] * xw).astype(z_ref.dtype)


def _gcn_propagate_kernel(adj_ref, z_ref, d_ref, b_ref, out_ref):
    """Row-tiled path, pass 2:  out_rows = d_rows * (A_rows @ z) + b.
    Blocks: adj (1,tm,N) cdt | z (1,N,Cp) cdt | d (1,tm,1) f32
            b (1,Cp) f32     | out (1,tm,Cp) f32."""
    h = jnp.einsum("bij,bjc->bic", adj_ref[...], z_ref[...],
                   preferred_element_type=jnp.float32)
    out_ref[...] = d_ref[...] * h + b_ref[...]


# ---------------------------------------------------------------------------
# Host-side helpers (hoisted out of the per-layer hot path)
# ---------------------------------------------------------------------------

def pad_gcn_params(weight, bias):
    """Pad GCN weight/bias ONCE at init so kernel output stores are lane-dense."""
    C_in, C_out = weight.shape
    Cp = _round_up(C_out, LANE)
    w_pad = jnp.zeros((C_in, Cp), jnp.float32).at[:, :C_out].set(
        weight.astype(jnp.float32))
    b_pad = jnp.zeros((1, Cp), jnp.float32).at[0, :C_out].set(
        bias.astype(jnp.float32))
    return w_pad, b_pad


def gcn_inv_sqrt_degree(adj_mat):
    """d = rsqrt(rowsum(relu(A))) per graph, with a zero-degree guard.

    Hoisted out of the per-layer kernel: RGmodule applies share_gcn1 and
    share_gcn2 on the same adjacency, so this is computed once per forward."""
    deg = jnp.sum(jnp.maximum(adj_mat, 0.0), axis=-1, keepdims=True)
    return jnp.where(deg > 0, jax.lax.rsqrt(deg), 0.0).astype(jnp.float32)


@functools.partial(jax.jit, static_argnames=("c_out", "use_bf16", "tiling"))
def gcn_conv_batched(node_ft, adj_mat, d, w_pad, b_pad, *, c_out,
                     use_bf16=True, tiling="auto"):
    """Batched GCNConv forward:  out[b] = D^{-1/2} A D^{-1/2} X W + bias.

    node_ft [B,N,Cin] f32 | adj_mat [B,N,N] | d [B,N,1] (gcn_inv_sqrt_degree)
    w_pad [Cin,Cp] | b_pad [1,Cp] (pad_gcn_params)  ->  [B,N,c_out] f32.
    """
    B, N, C_in = node_ft.shape
    Cp = w_pad.shape[1]
    cdt = jnp.bfloat16 if use_bf16 else jnp.float32
    cdt_bytes = 2 if use_bf16 else 4
    vmem_limit = _vmem_limit_bytes()
    w_cdt = w_pad.astype(cdt)

    Np = _round_up(N, SUBLANE)
    per_graph_adj = Np * Np * cdt_bytes
    if tiling == "auto":
        tiling = "fused" if per_graph_adj <= _FUSED_ADJ_BUDGET else "rows"

    if tiling == "fused":
        # --- whole-graph kernel, several graphs per grid step ----------------
        # Keep >=2 grid steps so v7x megacore can shard; cap per-step adj bytes.
        Bb = max(1, pl.cdiv(B, 2))
        Bb = min(Bb, max(1, _FUSED_ADJ_BUDGET // max(per_graph_adj, 1)))
        Bp = _round_up(B, Bb)

        pad_b, pad_n = Bp - B, Np - N
        if pad_b or pad_n:
            adj_p = jnp.pad(adj_mat, ((0, pad_b), (0, pad_n), (0, pad_n)))
            x_p = jnp.pad(node_ft, ((0, pad_b), (0, pad_n), (0, 0)))
            d_p = jnp.pad(d, ((0, pad_b), (0, pad_n), (0, 0)))
        else:
            adj_p, x_p, d_p = adj_mat, node_ft, d
        adj_p = adj_p.astype(cdt)          # bf16 adjacency in HBM: halves DMA
        x_p = x_p.astype(jnp.float32)
        d_p = d_p.astype(jnp.float32)

        out = pl.pallas_call(
            _gcn_fused_kernel,
            out_shape=jax.ShapeDtypeStruct((Bp, Np, Cp), jnp.float32),
            grid=(Bp // Bb,),
            in_specs=[
                pl.BlockSpec((Bb, Np, Np), lambda i: (i, 0, 0)),     # adj
                pl.BlockSpec((Bb, Np, C_in), lambda i: (i, 0, 0)),   # features
                pl.BlockSpec((Bb, Np, 1), lambda i: (i, 0, 0)),      # d (precomputed)
                pl.BlockSpec((C_in, Cp), lambda i: (0, 0)),          # shared weight
                pl.BlockSpec((1, Cp), lambda i: (0, 0)),             # shared bias
            ],
            out_specs=pl.BlockSpec((Bb, Np, Cp), lambda i: (i, 0, 0)),
            compiler_params=pltpu.CompilerParams(
                dimension_semantics=("parallel",),
                vmem_limit_bytes=vmem_limit,
            ),
        )(adj_p, x_p, d_p, w_cdt, b_pad)
        return out[:B, :N, :c_out]

    # --- row-tiled path (large N; fits v7x's 64 MiB VMEM) --------------------
    tm = min(_ROW_TILE, Np)
    Npad = _round_up(Np, tm)
    pad_n = Npad - N
    if pad_n:
        adj_p = jnp.pad(adj_mat, ((0, 0), (0, pad_n), (0, pad_n)))
        x_p = jnp.pad(node_ft, ((0, 0), (0, pad_n), (0, 0)))
        d_p = jnp.pad(d, ((0, 0), (0, pad_n), (0, 0)))
    else:
        adj_p, x_p, d_p = adj_mat, node_ft, d
    adj_p = adj_p.astype(cdt)
    x_p = x_p.astype(jnp.float32)
    d_p = d_p.astype(jnp.float32)

    # Pass 1: z = d * (X @ W), once per graph (cheap O(N*Cin*Cp)).
    z = pl.pallas_call(
        _gcn_project_kernel,
        out_shape=jax.ShapeDtypeStruct((B, Npad, Cp), cdt),
        grid=(B,),
        in_specs=[
            pl.BlockSpec((1, Npad, C_in), lambda b: (b, 0, 0)),
            pl.BlockSpec((1, Npad, 1), lambda b: (b, 0, 0)),
            pl.BlockSpec((C_in, Cp), lambda b: (0, 0)),
        ],
        out_specs=pl.BlockSpec((1, Npad, Cp), lambda b: (b, 0, 0)),
        compiler_params=pltpu.CompilerParams(
            dimension_semantics=("parallel",),
            vmem_limit_bytes=vmem_limit,
        ),
    )(x_p, d_p, w_cdt)

    # Pass 2: stream adjacency row tiles (dominant O(N^2*Cp) work).
    out = pl.pallas_call(
        _gcn_propagate_kernel,
        out_shape=jax.ShapeDtypeStruct((B, Npad, Cp), jnp.float32),
        grid=(B, Npad // tm),
        in_specs=[
            pl.BlockSpec((1, tm, Npad), lambda b, r: (b, r, 0)),   # adj row tile
            pl.BlockSpec((1, Npad, Cp), lambda b, r: (b, 0, 0)),   # z (fetched once/graph)
            pl.BlockSpec((1, tm, 1), lambda b, r: (b, r, 0)),      # d rows
            pl.BlockSpec((1, Cp), lambda b, r: (0, 0)),            # bias
        ],
        out_specs=pl.BlockSpec((1, tm, Cp), lambda b, r: (b, r, 0)),
        compiler_params=pltpu.CompilerParams(
            dimension_semantics=("parallel", "parallel"),
            vmem_limit_bytes=vmem_limit,
        ),
    )(adj_p, z, d_p, b_pad)
    return out[:B, :N, :c_out]


def reference_gcn(node_ft, adj_mat, weight, bias):
    """Pure-JAX reference matching the PyTorch get_laplace_mat + GCNConv math."""
    deg = jnp.sum(jnp.maximum(adj_mat, 0.0), axis=-1)
    dd = deg ** (-0.5)
    lap = dd[..., :, None] * adj_mat * dd[..., None, :]
    return lap @ node_ft @ weight + bias


if __name__ == "__main__":
    key = jax.random.PRNGKey(0)
    k_adj, k_x, k_w, k_adj2, k_x2 = jax.random.split(key, 5)

    # share_gcn inside RGmodule: h_dim -> h_dim
    B, N, C_in, C_out = 4, 16, 32, 32

    # Symmetric-ish adjacency with self loops per graph (degrees > 0).
    raw = jax.random.uniform(k_adj, (B, N, N), dtype=jnp.float32)
    adj_mat = 0.5 * (raw + jnp.swapaxes(raw, -1, -2)) + jnp.eye(N, dtype=jnp.float32)
    node_ft = jax.random.normal(k_x, (B, N, C_in), dtype=jnp.float32)

    # Deterministic parameter init matching nn.init.xavier_normal_ / zeros_.
    std = (2.0 / (C_in + C_out)) ** 0.5
    weight = std * jax.random.normal(k_w, (C_in, C_out), dtype=jnp.float32)
    bias = jnp.zeros((C_out,), dtype=jnp.float32)

    # Hoisted once: padded params (init-time) and D^{-1/2} (per adjacency,
    # shared by share_gcn1 / share_gcn2).
    w_pad, b_pad = pad_gcn_params(weight, bias)
    d = gcn_inv_sqrt_degree(adj_mat)

    ref = reference_gcn(node_ft, adj_mat, weight, bias)

    # 1) Fused path, bf16 MXU inputs + f32 accumulation (default).
    out_bf16 = gcn_conv_batched(node_ft, adj_mat, d, w_pad, b_pad, c_out=C_out)
    jax.block_until_ready(out_bf16)
    assert out_bf16.shape == (B, N, C_out)
    assert jnp.allclose(out_bf16, ref, atol=3e-2, rtol=3e-2)

    # 2) Fused path, pure f32 (faithful to the PyTorch math).
    out_f32 = gcn_conv_batched(node_ft, adj_mat, d, w_pad, b_pad,
                               c_out=C_out, use_bf16=False)
    jax.block_until_ready(out_f32)
    assert jnp.allclose(out_f32, ref, atol=1e-4, rtol=1e-4)

    # 3) Row-tiled (large-N / v7x-safe) path, forced at a moderate N to verify.
    B2, N2 = 2, 256
    raw2 = jax.random.uniform(k_adj2, (B2, N2, N2), dtype=jnp.float32)
    adj2 = 0.5 * (raw2 + jnp.swapaxes(raw2, -1, -2)) + jnp.eye(N2, dtype=jnp.float32)
    x2 = jax.random.normal(k_x2, (B2, N2, C_in), dtype=jnp.float32)
    d2 = gcn_inv_sqrt_degree(adj2)
    ref2 = reference_gcn(x2, adj2, weight, bias)
    out_rows = gcn_conv_batched(x2, adj2, d2, w_pad, b_pad, c_out=C_out,
                                use_bf16=False, tiling="rows")
    jax.block_until_ready(out_rows)
    assert out_rows.shape == (B2, N2, C_out)
    assert jnp.allclose(out_rows, ref2, atol=2e-3, rtol=2e-3)

    print("KERNEL_OK")
</pallas_src>

<mosaic_0001>
module attributes {stable_mosaic.version = 11 : i64} {
  func.func @_gcn_fused_kernel(%arg0: i32, %arg1: memref<2x16x16xbf16, #tpu.memory_space<vmem>>, %arg2: memref<2x16x32xf32, #tpu.memory_space<vmem>>, %arg3: memref<2x16x1xf32, #tpu.memory_space<vmem>>, %arg4: memref<32x128xbf16, #tpu.memory_space<vmem>>, %arg5: memref<1x128xf32, #tpu.memory_space<vmem>>, %arg6: memref<2x16x128xf32, #tpu.memory_space<vmem>>) attributes {dimension_semantics = [#tpu.dimension_semantics<parallel>], iteration_bounds = array<i64: 2>, scalar_prefetch = 0 : i64, scratch_operands = 0 : i64, tpu.core_type = #tpu.core_type<tc>, window_params = [{transform_indices = @transform_0, window_bounds = array<i64: 2, 16, 16>}, {transform_indices = @transform_1, window_bounds = array<i64: 2, 16, 32>}, {transform_indices = @transform_2, window_bounds = array<i64: 2, 16, 1>}, {pipeline_mode = #tpu.pipeline_mode<synchronous>, transform_indices = @transform_3, window_bounds = array<i64: 32, 128>}, {pipeline_mode = #tpu.pipeline_mode<synchronous>, transform_indices = @transform_4, window_bounds = array<i64: 1, 128>}, {transform_indices = @transform_5, window_bounds = array<i64: 2, 16, 128>}]} {
    %c0 = arith.constant 0 : index
    %c0_0 = arith.constant 0 : index
    %c0_1 = arith.constant 0 : index
    %0 = vector.load %arg2[%c0, %c0_0, %c0_1] : memref<2x16x32xf32, #tpu.memory_space<vmem>>, vector<2x16x32xf32>
    %1 = vector.shape_cast %0 : vector<2x16x32xf32> to vector<32x32xf32>
    %2 = arith.truncf %1 : vector<32x32xf32> to vector<32x32xbf16>
    %c0_2 = arith.constant 0 : index
    %c0_3 = arith.constant 0 : index
    %3 = vector.load %arg4[%c0_2, %c0_3] : memref<32x128xbf16, #tpu.memory_space<vmem>>, vector<32x128xbf16>
    %cst = arith.constant dense<0.000000e+00> : vector<32x128xf32>
    %4 = tpu.matmul %2, %3, %cst {dimension_numbers = #tpu.dot_dimension_numbers<[1], [0], [0], [1], [0, 0, 1, 1], [], []>} : vector<32x32xbf16>, vector<32x128xbf16>, vector<32x128xf32> -> vector<32x128xf32>
    %5 = vector.shape_cast %4 : vector<32x128xf32> to vector<2x16x128xf32>
    %c0_4 = arith.constant 0 : index
    %c0_5 = arith.constant 0 : index
    %c0_6 = arith.constant 0 : index
    %6 = vector.load %arg3[%c0_4, %c0_5, %c0_6] : memref<2x16x1xf32, #tpu.memory_space<vmem>>, vector<2x16x1xf32>
    %7 = vector.broadcast %6 : vector<2x16x1xf32> to vector<2x16x128xf32>
    %8 = arith.mulf %7, %5 : vector<2x16x128xf32>
    %9 = arith.truncf %8 : vector<2x16x128xf32> to vector<2x16x128xbf16>
    %c0_7 = arith.constant 0 : index
    %c0_8 = arith.constant 0 : index
    %c0_9 = arith.constant 0 : index
    %10 = vector.load %arg1[%c0_7, %c0_8, %c0_9] : memref<2x16x16xbf16, #tpu.memory_space<vmem>>, vector<2x16x16xbf16>
    "tpu.trace_start"() <{level = 10 : i32, message = "bij,bjc->bic"}> : () -> ()
    %cst_10 = arith.constant dense<0.000000e+00> : vector<2x16x128xf32>
    %11 = tpu.matmul %10, %9, %cst_10 {dimension_numbers = #tpu.dot_dimension_numbers<[2], [1], [1], [2], [0, 0, 0, 1, 1, 2], [0], [0]>} : vector<2x16x16xbf16>, vector<2x16x128xbf16>, vector<2x16x128xf32> -> vector<2x16x128xf32>
    "tpu.trace_stop"() : () -> ()
    %c0_11 = arith.constant 0 : index
    %c0_12 = arith.constant 0 : index
    %c0_13 = arith.constant 0 : index
    %12 = vector.load %arg3[%c0_11, %c0_12, %c0_13] : memref<2x16x1xf32, #tpu.memory_space<vmem>>, vector<2x16x1xf32>
    %13 = vector.broadcast %12 : vector<2x16x1xf32> to vector<2x16x128xf32>
    %14 = arith.mulf %13, %11 : vector<2x16x128xf32>
    %c0_14 = arith.constant 0 : index
    %c0_15 = arith.constant 0 : index
    %15 = vector.load %arg5[%c0_14, %c0_15] : memref<1x128xf32, #tpu.memory_space<vmem>>, vector<1x128xf32>
    %16 = vector.shape_cast %15 : vector<1x128xf32> to vector<1x1x128xf32>
    %17 = vector.broadcast %16 : vector<1x1x128xf32> to vector<2x16x128xf32>
    %18 = arith.addf %14, %17 : vector<2x16x128xf32>
    %c0_16 = arith.constant 0 : index
    %c0_17 = arith.constant 0 : index
    %c0_18 = arith.constant 0 : index
    %19 = vector.load %arg6[%c0_16, %c0_17, %c0_18] : memref<2x16x128xf32, #tpu.memory_space<vmem>>, vector<2x16x128xf32>
    tpu.vector_store %arg6[%c0_16, %c0_17, %c0_18], %18 {strides = array<i32>} : memref<2x16x128xf32, #tpu.memory_space<vmem>>, vector<2x16x128xf32>,
    return
  }
  func.func @transform_0(%arg0: i32) -> (i32, i32, i32) {
    %c0_i32 = arith.constant 0 : i32
    %c0_i32_0 = arith.constant 0 : i32
    %c0_i32_1 = arith.constant 0 : i32
    return %arg0, %c0_i32, %c0_i32_0 : i32, i32, i32
  }
  func.func @transform_1(%arg0: i32) -> (i32, i32, i32) {
    %c0_i32 = arith.constant 0 : i32
    %c0_i32_0 = arith.constant 0 : i32
    %c0_i32_1 = arith.constant 0 : i32
    return %arg0, %c0_i32, %c0_i32_0 : i32, i32, i32
  }
  func.func @transform_2(%arg0: i32) -> (i32, i32, i32) {
    %c0_i32 = arith.constant 0 : i32
    %c0_i32_0 = arith.constant 0 : i32
    %c0_i32_1 = arith.constant 0 : i32
    return %arg0, %c0_i32, %c0_i32_0 : i32, i32, i32
  }
  func.func @transform_3(%arg0: i32) -> (i32, i32) {
    %c0_i32 = arith.constant 0 : i32
    %c0_i32_0 = arith.constant 0 : i32
    %c0_i32_1 = arith.constant 0 : i32
    return %c0_i32, %c0_i32_0 : i32, i32
  }
  func.func @transform_4(%arg0: i32) -> (i32, i32) {
    %c0_i32 = arith.constant 0 : i32
    %c0_i32_0 = arith.constant 0 : i32
    %c0_i32_1 = arith.constant 0 : i32
    return %c0_i32, %c0_i32_0 : i32, i32
  }
  func.func @transform_5(%arg0: i32) -> (i32, i32, i32) {
    %c0_i32 = arith.constant 0 : i32
    %c0_i32_0 = arith.constant 0 : i32
    %c0_i32_1 = arith.constant 0 : i32
    return %arg0, %c0_i32, %c0_i32_0 : i32, i32, i32
  }
}

</mosaic_0001>

<bundles_post_ra>
// kernel: gcn_conv_batched.1
= control target key start
LH: loop header
LB: loop body
LE: loop exit
PB: predicated region body
PF: predicated region fallthrough
CT: control target
= control target key end

     0   :  { %s1526_s0 = inlined_call_operand.hbm [shape: bf16[4,16,16], index: 0, kind: input, shape index: {}]   ;;  %s1527_s1 = inlined_call_operand.hbm [shape: f32[4,16,32], index: 1, kind: input, shape index: {}]   ;;  %s1528_s2 = inlined_call_operand.hbm [shape: f32[4,16,1], index: 2, kind: input, shape index: {}]   ;;  %s1529_s3 = inlined_call_operand.hbm [shape: bf16[32,128], index: 3, kind: input, shape index: {}]   ;;  %s1530_s4 = inlined_call_operand.hbm [shape: f32[1,128], index: 4, kind: input, shape index: {}]   ;;  %s1531_s5 = inlined_call_operand.hbm [shape: f32[4,16,128], index: 5, kind: output, shape index: {}]  }
   0x1   :  { %1552 = sst [smem:[#allocation21_spill]] %s1527_s1 }
   0x2   :  { %1553 = sst [smem:[#allocation22_spill]] %s1529_s3 }
   0x3   :  { %1554 = sst [smem:[#allocation23_spill]] %s1531_s5 }
   0x4   :  { %10 = vsyncpa [#allocation3], 0 }
   0x5   :  { %12 = vsyncpa [#allocation3 + $0x1], 0 }
   0x6   :  { %13 = vsyncpa [#allocation6], 0 }
   0x7   :  { %15 = vsyncpa [#allocation6 + $0x1], 0 }
   0x8   :  { %16 = vsyncpa [#allocation9], 0 }
   0x9   :  { %17 = vsyncpa [#allocation4], 0 }
   0xa   :  { %19 = vsyncpa [#allocation4 + $0x1], 0  ;;  %s1193_s18 = smov 0   ;;  %s1195_s19 = smov 0  }
   0xb   :  { %s1197_s20 = smov 0   ;;  %s1199_s21 = smov 0  }
   0xc LB: > { %1555 = sst [smem:[#allocation16_spill]] %s1134_s18  ;;  %s1214_s22 = sadd.s32 4294967295, %s1146_s21   ;;  %s1146_s21 = sphi %s1199_s21, %s1591_s21   ;;  %s1142_s20 = sphi %s1197_s20, %s1593_s20   ;;  %s1138_s19 = sphi %s1195_s19, %s1595_s19   ;;  %s1134_s18 = sphi %s1193_s18, %s1594_s18  }
   0xd   : > { %1556 = sst [smem:[#allocation17_spill]] %s1142_s20  ;;  %s759_s23 = sadd.s32 4294967294, %s1146_s21  }
   0xe   : > { %s1218_s24 = sadd.s32 1, %s1146_s21   ;;  %s32_s25 = sadd.s32 1, %s1142_s20 }
   0xf   : > { %1557 = sst [smem:[#allocation18_spill]] %s1218_s24  ;;  %s29_s26 = ssub.s32 %s1146_s21, %s1218_s24 }
  0x10   : > { %p39_p0 = scmp.ne.s32.totalorder %s1142_s20, %s1138_s19  ;;  %p30_p1 = scmp.eq.s32.totalorder %s29_s26, 0 }
  0x11   : > { %p40_p2 = scmp.eq.s32.totalorder %s1146_s21, 0  ;;  %p45_p3 = scmp.ne.s32.totalorder %s1138_s19, %s1134_s18 }
  0x12   : > { %p1532_p4 = scmp.eq.s32.totalorder %s1214_s22, 0  ;;  %p163_p7 = scmp.eq.s32.totalorder %s1214_s22, 1 }
  0x13   : > { %s1230_s27 = scalar_select %p30_p1, %s1142_s20, %s32_s25  }
  0x14   : > { %p1232_p5 = por %p40_p2, %p39_p0  ;;  %p1238_p6 = por %p1532_p4, %p45_p3 }
  0x15   : > { %1558 = sst [smem:[#allocation19_spill]] %s1230_s27  ;;  %p169_p8 = scmp.eq.s32.totalorder %s759_s23, 1 }
  0x16   : > { %s1559_s28 = scalar_select %p1232_p5, 1, 0 }
  0x17   : > { %s1560_s29 = scalar_select %p1238_p6, 1, 0 }
  0x18   : > { %p760_p9 = scmp.ge.s32.totalorder %s1146_s21, 1  ;;  %p176_p10 = scmp.lt.s32.totalorder %s1146_s21, 3 }
  0x19   : > { %p1245_p11 = por %p163_p7, %p39_p0  ;;  %p1249_p12 = por %p169_p8, %p45_p3 }
  0x1a   : > { %p1253_p13 = pnand %p760_p9, %p176_p10  ;;  %s1148_s8 = smov [#allocation8]  }
  0x1b   : > { %s1561_s30 = scalar_select %p1245_p11, 1, 0 }
  0x1c   : > { %s1562_s6 = scalar_select %p1249_p12, 1, 0 }
  0x1d   : > { %s1564_s7 = scalar_select %p1253_p13, 1, 0 }
  0x1e   : > { %1563 = sst [smem:[#allocation20_spill]] %s1562_s6  ;;  %p850_p1 = pneg %p1253_p13 }
  0x1f   : > { %s188_s9 = sshll.u32 %s1148_s8, 4  ;;  %s1268_s11 = sand.u32 1, %s1142_s20   ;;  %s189_s9 = int_to_ptr.vmem [resolvable:$true] %s188_s9 }
  0x20   : > { %p1261_p2 = pnand %p850_p1, %p1532_p4  ;;  %s235_s12 = sand.u32 1, %s1146_s21  }
  0x21   : > { %s1566_s3 = sld [smem:[#allocation22_spill]] }
  0x22   : > { %s1565_s10 = scalar_select %p1261_p2, 1, 0 }
  0x23   : > { %p1539_p8 = pneg %p1261_p2 }
  0x27   : > { %s926_s15 = scalar_lea.hbm %s1566_s3, 256 }
  0x28   : > { %p927_p7 = scmp.ne.s32.totalorder %s1566_s3, %s926_s15  ;;  %p933_p1 = scmp.lt.u32.totalorder %s926_s15, %s1566_s3 }
  0x2a   : > { %p929_p9 = pnand %p1539_p8, %p927_p7 }
  0x2c   : > { %p930_p10 = pneg %p929_p9 }
  0x2e   : > { %p935_p0 = pnand %p933_p1, %p930_p10 }
  0x30   : > { %938 = shalt.err (!%p935_p0)
}
  0x31   : > { %s939_s26 = scalar_lea.vmem %s189_s9, 256  ;;  %p947_p11 = scmp.lt.s32.totalorder %s189_s9, %s189_s9 }
  0x32   : > { %p940_p4 = scmp.ne.s32.totalorder %s189_s9, %s939_s26  ;;  %p948_p6 = scmp.lt.s32.totalorder %s939_s26, %s939_s26 }
  0x34   : > { %p942_p3 = pnand %p940_p4, %p1539_p8  ;;  %p949_p13 = por %p948_p6, %p947_p11 }
  0x36   : > { %p943_p12 = pneg %p942_p3 }
  0x38   : > { %p950_p5 = pnand %p949_p13, %p943_p12 }
  0x3a   : > { %953 = shalt.err (!%p950_p5)
}
  0x3b   : > { %s1536_s8 = smov 64   ;;  %s1537_s13 = smov 4  }
  0x3c   : > { %853 = dma.hbm_to_vmem [thread:$0]  (!%p1261_p2), %s1566_s3, 256, %s189_s9, [#allocation9], %s1536_s8, %s1536_s8, %s1537_s13  }
  0x3d   : > { %p1567_p4 = scmp.ne.s32.totalorder %s1559_s28, 0  ;;  %p1568_p6 = scmp.lt.s32.totalorder %s1146_s21, 2 }
  0x3e   : > { %s1538_s17 = sshll.u32 %s1268_s11, 5  ;;  %s801_s23 = sshll.u32 %s1146_s21, 9 }
  0x3f   : > { %p1300_p5 = pnand %p1568_p6, %p1567_p4  ;;  %s1570_s1 = sld [smem:[#allocation21_spill]] }
  0x40   : > { %s239_s28 = scalar_lea.vmem [#allocation5], %s1538_s17  ;;  %s1317_s14 = scalar_lea.sflag [#allocation6], %s235_s12 }
  0x41   : > { %s1569_s16 = scalar_select %p1300_p5, 1, 0 }
  0x42   : > { %s247_s9 = sshll.u32 %s239_s28, 4  ;;  %p1323_p12 = pneg %p1300_p5  ;;  %s1315_s9 = int_to_ptr.vmem [resolvable:$true] %s247_s9 }
  0x44   : > { %s1571_s8 = scalar_select %p1323_p12, 1, 0 }
  0x45   : > { %s1311_s27 = scalar_lea.hbm %s1570_s1, %s801_s23  ;;  %s959_s13 = scalar_lea.hbm %s1570_s1, 1024 }
  0x46   : > { %s954_s15 = scalar_lea.hbm %s1311_s27, 512  ;;  %p960_p3 = scmp.lt.u32.totalorder %s1311_s27, %s1570_s1 }
  0x47   : > { %p955_p11 = scmp.ne.s32.totalorder %s1311_s27, %s954_s15  ;;  %p961_p7 = scmp.lt.u32.totalorder %s959_s13, %s954_s15 }
  0x48   : > { %p963_p10 = scmp.lt.u32.totalorder %s954_s15, %s1311_s27 }
  0x49   : > { %p957_p13 = pnand %p1323_p12, %p955_p11  ;;  %p962_p9 = por %p961_p7, %p960_p3 }
  0x4b   : > { %p958_p0 = pneg %p957_p13  ;;  %p964_p1 = por %p963_p10, %p962_p9 }
  0x4d   : > { %p965_p4 = pnand %p964_p1, %p958_p0 }
  0x4f   : > { %968 = shalt.err (!%p965_p4)
}
  0x50   : > { %s969_s12 = scalar_lea.vmem %s1315_s9, 512  ;;  %s1151_s25 = smov [#allocation5]  }
  0x51   : > { %p970_p6 = scmp.ne.s32.totalorder %s1315_s9, %s969_s12  ;;  %s974_s26 = sshll.u32 %s1151_s25, 4  ;;  %s975_s26 = int_to_ptr.vmem [resolvable:$false] %s974_s26 }
  0x52   : > { %s976_s17 = scalar_lea.vmem %s975_s26, 1024  ;;  %p977_p8 = scmp.lt.s32.totalorder %s1315_s9, %s975_s26 }
  0x53   : > { %p972_p11 = pnand %p970_p6, %p1323_p12  ;;  %p978_p2 = scmp.lt.s32.totalorder %s976_s17, %s969_s12 }
  0x55   : > { %p973_p13 = pneg %p972_p11  ;;  %p979_p3 = por %p978_p2, %p977_p8 }
  0x57   : > { %p980_p7 = pnand %p979_p3, %p973_p13 }
  0x59   : > { %983 = shalt.err (!%p980_p7)
}
  0x5a   : > { %s1152_s13 = smov 128   ;;  %s1153_s15 = smov 8  }
  0x5b   : > { %863 = dma.hbm_to_vmem [thread:$0]  (!%p1300_p5), %s1311_s27, 512, %s1315_s9, %s1317_s14, %s1152_s13, %s1152_s13, %s1153_s15  }
  0x5c   : > { %s1355_s25 = scalar_lea.hbm %s1528_s2, %s801_s23  ;;  %s1572_s26 = sshll.u32 %s1268_s11, 5 }
  0x5d   : > { %s261_s17 = scalar_lea.vmem [#allocation7], %s1572_s26  ;;  %s1154_s3 = smov [#allocation10]  }
  0x5e   : > { %s269_s1 = sshll.u32 %s261_s17, 4  ;;  %s202_s20 = sshll.u32 %s1154_s3, 4  ;;  %s1359_s1 = int_to_ptr.vmem [resolvable:$true] %s269_s1  ;;  %s203_s20 = int_to_ptr.vmem [resolvable:$true] %s202_s20 }
  0x5f   : > { %s764_s24 = sshll.u32 %s1268_s11, 4  ;;  %s984_s5 = scalar_lea.hbm %s1530_s4, 16 }
  0x60   : > { %p985_p2 = scmp.ne.s32.totalorder %s1530_s4, %s984_s5  ;;  %p1573_p8 = scmp.ne.s32.totalorder %s1565_s10, 0 }
  0x61   : > { %p991_p1 = scmp.lt.u32.totalorder %s984_s5, %s1530_s4 }
  0x62   : > { %p1574_p0 = pneg %p1573_p8 }
  0x64   : > { %p987_p9 = pnand %p985_p2, %p1574_p0 }
  0x66   : > { %p988_p10 = pneg %p987_p9 }
  0x68   : > { %p993_p4 = pnand %p991_p1, %p988_p10 }
  0x6a   : > { %996 = shalt.err (!%p993_p4)
}
  0x6b   : > { %s997_s3 = scalar_lea.vmem %s203_s20, 16  ;;  %p1575_p11 = pmov %p1574_p0 }
  0x6c   : > { %p998_p6 = scmp.ne.s32.totalorder %s203_s20, %s997_s3  ;;  %s1004_s18 = scalar_lea.vmem %s203_s20, 32 }
  0x6d   : > { %p1005_p7 = scmp.lt.s32.totalorder %s203_s20, %s203_s20  ;;  %p1006_p5 = scmp.lt.s32.totalorder %s1004_s18, %s997_s3 }
  0x6e   : > { %p1000_p13 = pnand %p998_p6, %p1575_p11 }
  0x6f   : > { %p1007_p12 = por %p1006_p5, %p1005_p7 }
  0x70   : > { %p1001_p3 = pneg %p1000_p13 }
  0x72   : > { %p1008_p0 = pnand %p1007_p12, %p1001_p3 }
  0x74   : > { %1011 = shalt.err (!%p1008_p0)
}
  0x75   : > { %856 = dma.hbm_to_vmem [thread:$0]  (!%p1573_p8), %s1530_s4, 16, %s203_s20, [#allocation9]  }
  0x76   : > { %s799_s5 = sshll.u32 %s1146_s21, 8  ;;  %s217_s9 = scalar_lea.vmem [#allocation2], %s764_s24 }
  0x77   : > { %s1386_s27 = scalar_lea.hbm %s1526_s0, %s799_s5  ;;  %s225_s23 = sshll.u32 %s217_s9, 4  ;;  %s1388_s23 = int_to_ptr.vmem [resolvable:$true] %s225_s23 }
  0x78   : > { %s214_s10 = scalar_lea.sflag [#allocation3], %s1268_s11  ;;  %s1012_s28 = scalar_lea.hbm %s1386_s27, 256 }
  0x79   : > { %p1013_p5 = scmp.ne.s32.totalorder %s1386_s27, %s1012_s28  ;;  %p1576_p12 = scmp.ne.s32.totalorder %s1571_s8, 0 }
  0x7a   : > { %s1017_s18 = scalar_lea.hbm %s1526_s0, 512  ;;  %p1018_p9 = scmp.lt.u32.totalorder %s1386_s27, %s1526_s0 }
  0x7b   : > { %p1015_p2 = pnand %p1013_p5, %p1576_p12  ;;  %p1019_p10 = scmp.lt.u32.totalorder %s1017_s18, %s1012_s28 }
  0x7c   : > { %p1021_p4 = scmp.lt.u32.totalorder %s1012_s28, %s1386_s27 }
  0x7d   : > { %p1016_p8 = pneg %p1015_p2  ;;  %p1020_p1 = por %p1019_p10, %p1018_p9 }
  0x7f   : > { %p1022_p6 = por %p1021_p4, %p1020_p1 }
  0x81   : > { %p1023_p11 = pnand %p1022_p6, %p1016_p8 }
  0x83   : > { %1026 = shalt.err (!%p1023_p11)
}
  0x84   : > { %s1027_s24 = scalar_lea.vmem %s1388_s23, 256  ;;  %s1155_s5 = smov [#allocation2]  }
  0x85   : > { %p1028_p13 = scmp.ne.s32.totalorder %s1388_s23, %s1027_s24  ;;  %s1032_s26 = sshll.u32 %s1155_s5, 4  ;;  %s1033_s26 = int_to_ptr.vmem [resolvable:$false] %s1032_s26 }
  0x86   : > { %s1034_s17 = scalar_lea.vmem %s1033_s26, 512  ;;  %p1035_p0 = scmp.lt.s32.totalorder %s1388_s23, %s1033_s26 }
  0x87   : > { %p1030_p3 = pnand %p1028_p13, %p1576_p12  ;;  %p1036_p5 = scmp.lt.s32.totalorder %s1034_s17, %s1027_s24 }
  0x89   : > { %p1031_p7 = pneg %p1030_p3  ;;  %p1037_p2 = por %p1036_p5, %p1035_p0 }
  0x8b   : > { %p1038_p9 = pnand %p1037_p2, %p1031_p7 }
  0x8d   : > { %1041 = shalt.err (!%p1038_p9)
}
  0x8e   : > { %p1577_p8 = scmp.ne.s32.totalorder %s1569_s16, 0  ;;  %s1578_s9 = smov 4  }
  0x8f   : > { %s1579_s28 = smov 64   ;;  %s1042_s20 = scalar_lea.hbm %s1355_s25, 512 }
  0x90   : > { %860 = dma.hbm_to_vmem [thread:$0]  (!%p1577_p8), %s1386_s27, 256, %s1388_s23, %s214_s10, %s1579_s28, %s1579_s28, %s1578_s9  }
  0x91   : > { %p1043_p10 = scmp.ne.s32.totalorder %s1355_s25, %s1042_s20  ;;  %s1047_s6 = scalar_lea.hbm %s1528_s2, 1024 }
  0x92   : > { %p1048_p6 = scmp.lt.u32.totalorder %s1355_s25, %s1528_s2  ;;  %p1049_p11 = scmp.lt.u32.totalorder %s1047_s6, %s1042_s20 }
  0x93   : > { %p1045_p1 = pnand %p1043_p10, %p1576_p12  ;;  %p1051_p3 = scmp.lt.u32.totalorder %s1042_s20, %s1355_s25 }
  0x94   : > { %p1050_p13 = por %p1049_p11, %p1048_p6 }
  0x95   : > { %p1046_p4 = pneg %p1045_p1 }
  0x96   : > { %p1052_p7 = por %p1051_p3, %p1050_p13 }
  0x98   : > { %p1053_p0 = pnand %p1052_p7, %p1046_p4 }
  0x9a   : > { %1056 = shalt.err (!%p1053_p0)
}
  0x9b   : > { %s1057_s11 = scalar_lea.vmem %s1359_s1, 512  ;;  %s1156_s27 = smov [#allocation7]  }
  0x9c   : > { %p1058_p5 = scmp.ne.s32.totalorder %s1359_s1, %s1057_s11  ;;  %s1062_s23 = sshll.u32 %s1156_s27, 4  ;;  %s1063_s23 = int_to_ptr.vmem [resolvable:$false] %s1062_s23 }
  0x9d   : > { %s1064_s10 = scalar_lea.vmem %s1063_s23, 1024  ;;  %p1065_p10 = scmp.lt.s32.totalorder %s1359_s1, %s1063_s23 }
  0x9e   : > { %p1060_p2 = pnand %p1058_p5, %p1576_p12  ;;  %p1066_p1 = scmp.lt.s32.totalorder %s1064_s10, %s1057_s11 }
  0xa0   : > { %p1061_p9 = pneg %p1060_p2  ;;  %p1067_p6 = por %p1066_p1, %p1065_p10 }
  0xa2   : > { %p1068_p11 = pnand %p1067_p6, %p1061_p9 }
  0xa4   : > { %1071 = shalt.err (!%p1068_p11)
}
  0xa5   : > { %866 = dma.hbm_to_vmem [thread:$0]  (!%p1577_p8), %s1355_s25, 512, %s1359_s1, %s1317_s14, %s1152_s13, %s1152_s13, %s1153_s15  }
  0xa6   : > { %p1580_p12 = scmp.ne.s32.totalorder %s1564_s7, 0 }
  0xa7   : > { %s1445_s8 = sand.u32 (!%p1580_p12), 1, %s1138_s19   ;;  %p1581_p4 = scmp.ne.s32.totalorder (!%p1580_p12), %s1560_s29, 0 }
  0xa8   : > { %281 = sbr.rel (%p1580_p12) target bundleno = 655 (0x28f), region = 40  ;;  %s777_s5 = sshll.u32 (!%p1580_p12), %s1445_s8, 4 }
  0xa9   : > { %s284_s26 = scalar_lea.sflag (!%p1580_p12), [#allocation3], %s1445_s8  ;;  %s1449_s17 = scalar_lea.vmem (!%p1580_p12), [#allocation2], %s777_s5 }
  0xaf   : > { %1117 = dma.done.wait (%p1581_p4), %s284_s26, 256  }
  0xb0   : > { %1119 = vsyncadd (%p1581_p4), %s284_s26, 4294967040  ;;  %s292_s1 = sand.u32 1, %s1214_s22   ;;  %s1457_s7 = sshll.u32 %s1445_s8, 5 }
  0xb1   : > { %s293_s16 = scalar_lea.sflag [#allocation6], %s292_s1  ;;  %s296_s14 = scalar_lea.vmem [#allocation5], %s1457_s7 }
  0xb2   : > { %1121 = dma.done.wait (%p1581_p4), %s293_s16, 1024  }
  0xb3   : > { %1123 = vsyncadd (%p1581_p4), %s293_s16, 4294966272  ;;  %s305_s13 = scalar_lea.vmem [#allocation7], %s1457_s7  ;;  %p1582_p8 = scmp.eq.s32.totalorder %s1214_s22, 0 }
  0xb5   : > { %1125 = dma.done.wait (%p1582_p8), [#allocation9], 272   ;;  %p1583_p13 = pmov %p1582_p8 }
  0xb6   : > { %v1157_v0 = vmov 0   ;;  %v922_v1 = vld [vmem:[#allocation8] sm:$0xff]   ;;  %v923_v2 = vld [vmem:[#allocation8 + $0x8] sm:$0xff]   ;;  %vm377_vm0 = vcmask 261120   ;;  %v357_v5 = vld [vmem:[%s296_s14 + $0x10] sm:$0xff]  ;;  %v1158_v13 = vmov 0.0  }
  0xb7   : > { %1127 = vsyncadd (%p1583_p13), [#allocation9], 4294967024  ;;  %920 = vset.pattern.permute.xlu0 %v1157_v0  ;;  %921 = vset.pattern.permute.xlu1 %v1157_v0  ;;  %v355_v3 = vld [vmem:[%s296_s14] sm:$0xff]  ;;  %v356_v4 = vld [vmem:[%s296_s14 + $0x8] sm:$0xff]  ;;  %vm1159_vm1 = vmmov 0   ;;  %vm472_vm2 = vcmask 130048  }
  0xb8   : > { %814 = vmatprep.subr.bf16.mxu0 %v922_v1  ;;  %v359_v6 = vpack.c.bf16 %v356_v4, %v355_v3  ;;  %v358_v7 = vld [vmem:[%s296_s14 + $0x18] sm:$0xff]  ;;  %v433_v8 = vld [vmem:[%s305_s13] sm:$0xff]  ;;  %v435_v9 = vld [vmem:[%s305_s13 + $0x10] sm:$0xff]  ;;  %822 = vmatprep.subr.bf16.mxu1 %v1158_v13  ;;  %s349_s29 = scalar_lea.vmem [#allocation11], %s1457_s7  ;;  %s805_s25 = sshll.u32 %s1214_s22, 9 }
  0xb9   : > { %815 = vmatpush3.bf16.msra.mxu0 %v922_v1  ;;  %439 = vperm.xlu0 %920, %v433_v8   ;;  %v434_v10 = vld [vmem:[%s305_s13 + $0x8] sm:$0xff]  ;;  %v360_v11 = vpack.c.bf16 %v358_v7, %v357_v5  ;;  %v436_v12 = vld [vmem:[%s305_s13 + $0x18] sm:$0xff]  ;;  %v924_v28 = vld [vmem:[%s1449_s17] sm:$0xff]   ;;  %s624_s15 = sshll.u32 %s349_s29, 4  ;;  %s1584_s20 = sld [smem:[#allocation23_spill]]  ;;  %s1477_s15 = int_to_ptr.vmem [resolvable:$true] %s624_s15 }
  0xba   : > { %816 = vmatprep.subr.bf16.mxu0 %v923_v2  ;;  %818 = vmatprep.mubr.msk.bf16.mxu0 %vm377_vm0, %v359_v6  ;;  %v925_v29 = vld [vmem:[%s1449_s17 + $0x8] sm:$0xff]   ;;  %v791_v32 = vld [vmem:[#allocation10] ss:$0 sm:$0xff]  ;;  %s610_s6 = scalar_lea.sflag [#allocation4], %s1445_s8  ;;  %s1072_s22 = scalar_lea.vmem %s1477_s15, 512 }
  0xbb   : > { %449 = vperm.xlu1 %921, %v435_v9   ;;  %824 = vmatprep.mubr.msk.bf16.mxu1 %vm1159_vm1, %v1158_v13  ;;  %p1073_p3 = scmp.ne.s32.totalorder %s1477_s15, %s1072_s22  ;;  %p1586_p7 = scmp.ne.s32.totalorder %s1561_s30, 0 }
  0xbc   : > { %s1160_s12 = smov [#allocation11]  }
  0xbd   : > { %817 = vmatpush3.bf16.msra.mxu0 %v923_v2  ;;  %444 = vperm.xlu0 %920, %v434_v10   ;;  %p1074_p0 = pnand %p1073_p3, %p1586_p7  ;;  %s1076_s24 = sshll.u32 %s1160_s12, 4  ;;  %s1077_s24 = int_to_ptr.vmem [resolvable:$false] %s1076_s24 }
  0xbe   : > { %s1078_s11 = scalar_lea.vmem %s1077_s24, 1024  ;;  %p1079_p2 = scmp.lt.s32.totalorder %s1477_s15, %s1077_s24 }
  0xbf   : > { %454 = vperm.xlu1 %921, %v436_v12   ;;  %s1585_s3 = smov %s1584_s20  ;;  %s1482_s18 = scalar_lea.hbm %s1584_s20, %s805_s25 }
  0xc0   : > { %819 = vmatmul.mubr.msk.bf16.vlgmr.msra.gmra.mrb[0].mxu0 %vm377_vm0, %v360_v11  ;;  %p1075_p5 = pneg %p1074_p0  ;;  %p1080_p9 = scmp.lt.s32.totalorder %s1078_s11, %s1072_s22 }
  0xc1   : > { %572 = vperm.xlu0 %920, %v433_v8  }
  0xc2   : > { %p1081_p10 = por %p1080_p9, %p1079_p2 }
  0xc3   : > { %577 = vperm.xlu1 %921, %v434_v10  }
  0xc4   : > { %p1082_p1 = pnand %p1081_p10, %p1075_p5 }
  0xc5   : > { %582 = vperm.xlu0 %920, %v435_v9  }
  0xc7   : > { %587 = vperm.xlu1 %921, %v436_v12  }
 0x138   : > { %v440_v15 = vpop.permute.xlu0 %439 }
 0x13a   : > { %v450_v14 = vpop.permute.xlu1 %449 }
 0x13c   : > { %v445_v20 = vpop.permute.xlu0 %444 }
 0x13e   : > { %v455_v18 = vpop.permute.xlu1 %454 }
 0x140   : > { %v573_v30 = vpop.permute.xlu0 %572 }
 0x142   : > { %v578_v35 = vpop.permute.xlu1 %577 }
 0x144   : > { %v583_v41 = vpop.permute.xlu0 %582 }
 0x146   : > { %v588_v45 = vpop.permute.xlu1 %587 }
 0x193   : > { %v820_v16 = vpop.f32.mrb[0].mxu0 }
 0x194   : > { %v418_v17 = vpop.f32.mrb[1].mxu0  ;;  %v459_v21 = vmul.f32 %v820_v16, %v450_v14 }
 0x195   : > { %v821_v19 = vpop.f32.mrb[2].mxu0  ;;  %v457_v24 = vmul.f32 %v440_v15, %v418_v17 }
 0x196   : > { %v460_v22 = vmul.f32 %v821_v19, %v455_v18  ;;  %v421_v23 = vpop.f32.mrb[3].mxu0 }
 0x197   : > { %v458_v25 = vmul.f32 %v445_v20, %v421_v23 }
 0x198   : > { %v462_v26 = vpack.c.bf16 %v460_v22, %v459_v21 }
 0x199   : > { %v461_v27 = vpack.c.bf16 %v458_v25, %v457_v24 }
 0x19b   : > { %823 = vmatpush3.bf16.msra.mxu1 %v461_v27 }
 0x19c   : > { %828 = vmatprep.subr.bf16.mxu1 %v1158_v13 }
 0x19e   : > { %825 = vmatmul.mubr.msk.bf16.vlgmr.msra.gmra.mrb[0].mxu1 %vm472_vm2, %v924_v28 }
 0x19f   : > { %829 = vmatpush3.bf16.msra.mxu1 %v462_v26  ;;  %830 = vmatprep.mubr.msk.bf16.mxu1 %vm1159_vm1, %v1158_v13 }
 0x1a6   : > { %831 = vmatmul.mubr.msk.bf16.vlgmr.msra.gmra.mrb[4].mxu1 %vm472_vm2, %v925_v29 }
 0x271   : > { %v510_v31 = vpop.f32.mrb[0].mxu1 }
 0x272   : > { %v590_v33 = vmul.f32 %v573_v30, %v510_v31  ;;  %v826_v34 = vpop.f32.mrb[1].mxu1 }
 0x273   : > { %v513_v36 = vpop.f32.mrb[2].mxu1 }
 0x274   : > { %v601_v37 = vadd.f32 %v791_v32, %v590_v33  ;;  %v591_v38 = vmul.f32 %v578_v35, %v513_v36  ;;  %v827_v39 = vpop.f32.mrb[3].mxu1 }
 0x276   : > { %605 = vst [vmem:[%s349_s29] sm:$0xff] %v601_v37  ;;  %v602_v40 = vadd.f32 %v791_v32, %v591_v38 }
 0x278   : > { %606 = vst [vmem:[%s349_s29 + $0x8] sm:$0xff] %v602_v40 }
 0x279   : > { %v559_v42 = vpop.f32.mrb[4].mxu1 }
 0x27a   : > { %v592_v43 = vmul.f32 %v583_v41, %v559_v42  ;;  %v832_v44 = vpop.f32.mrb[5].mxu1 }
 0x27b   : > { %v562_v46 = vpop.f32.mrb[6].mxu1 }
 0x27c   : > { %v603_v47 = vadd.f32 %v791_v32, %v592_v43  ;;  %v593_v48 = vmul.f32 %v588_v45, %v562_v46  ;;  %v833_v49 = vpop.f32.mrb[7].mxu1 }
 0x27e   : > { %607 = vst [vmem:[%s349_s29 + $0x10] sm:$0xff] %v603_v47  ;;  %v604_v50 = vadd.f32 %v791_v32, %v593_v48 }
 0x280   : > { %608 = vst [vmem:[%s349_s29 + $0x18] sm:$0xff] %v604_v50 }
 0x281   : > { %1085 = shalt.err (!%p1082_p1)
}
 0x282   : > { %s1086_s27 = scalar_lea.hbm %s1482_s18, 512  ;;  %s1090_s5 = scalar_lea.hbm %s1585_s3, 1024 }
 0x283   : > { %p1087_p6 = scmp.ne.s32.totalorder %s1482_s18, %s1086_s27  ;;  %p1091_p4 = scmp.lt.u32.totalorder %s1482_s18, %s1585_s3 }
 0x284   : > { %p1092_p8 = scmp.lt.u32.totalorder %s1090_s5, %s1086_s27  ;;  %p1094_p3 = scmp.lt.u32.totalorder %s1086_s27, %s1482_s18 }
 0x285   : > { %p1088_p11 = pnand %p1087_p6, %p1586_p7 }
 0x286   : > { %p1093_p13 = por %p1092_p8, %p1091_p4 }
 0x287   : > { %p1089_p12 = pneg %p1088_p11 }
 0x288   : > { %p1095_p0 = por %p1094_p3, %p1093_p13 }
 0x28a   : > { %p1096_p5 = pnand %p1095_p0, %p1089_p12 }
 0x28c   : > { %1099 = shalt.err (!%p1096_p5)
}
 0x28d   : > { %s1161_s1 = smov 128   ;;  %s1162_s7 = smov 8  }
 0x28e   : > { %848 = dma.vmem_to_hbm [thread:$0]  (%p1586_p7), %s1477_s15, 512, %s1482_s18, %s610_s6, %s1161_s1, %s1161_s1, %s1162_s7  }
 0x28f PF: > { %s1587_s16 = sld [smem:[#allocation16_spill]]  ;;  %s1588_s14 = sld [smem:[#allocation20_spill]] }
 0x290   : > { %p1590_p9 = scmp.ge.s32.totalorder %s1146_s21, 2 }
 0x295   : > { %s639_s13 = sand.u32 1, %s1587_s16   ;;  %p1589_p2 = scmp.ne.s32.totalorder %s1588_s14, 0 }
 0x296   : > { %s640_s29 = scalar_lea.sflag [#allocation4], %s639_s13 }
 0x297   : > { %p868_p10 = pnand %p1590_p9, %p1589_p2 }
 0x299   : > { %1129 = dma.done.wait (!%p868_p10), %s640_s29, 512  }
 0x29a   : > { %1131 = vsyncadd (!%p868_p10), %s640_s29, 4294966784  ;;  %s1591_s21 = sld [smem:[#allocation18_spill]]  ;;  %s1592_s25 = sld [smem:[#allocation17_spill]] }
 0x29b   : > { %s1593_s20 = sld [smem:[#allocation19_spill]]  ;;  %s1594_s18 = smov %s1138_s19 }
 0x2a0   : > { %p22_p1 = scmp.ge.s32.totalorder %s1591_s21, 4   ;;  %s1595_s19 = smov %s1592_s25 }
 0x2a2   :  { %24 = sbr.rel (!%p22_p1) target bundleno = 12 (0xc), region = 117 }
 0x2a9   :  { %645 = vsyncpa [#allocation3], 1 }
 0x2aa   :  { %647 = vsyncpa [#allocation3 + $0x1], 1 }
 0x2ab   :  { %648 = vsyncpa [#allocation6], 1 }
 0x2ac   :  { %650 = vsyncpa [#allocation6 + $0x1], 1 }
 0x2ad   :  { %651 = vsyncpa [#allocation9], 1 }
 0x2ae   :  { %652 = vsyncpa [#allocation4], 1 }
 0x2af   :  { %654 = vsyncpa [#allocation4 + $0x1], 1 }

</bundles_post_ra>
